<compile_context>
chip_gen: v5e
topology: v5e:2x2
jax: 0.10.0
libtpu: 0.0.40
codegen_flags: <defaults>
</compile_context>

<pallas_src>
import functools

import jax
import jax.numpy as jnp
from jax.experimental import pallas as pl
from jax.experimental.pallas import tpu as pltpu


def _round_up(x, m):
    return ((x + m - 1) // m) * m


def _student_t_power(t, alpha):
    """t ** (-(alpha + 1) / 2) with cheap recip/rsqrt for (half-)integer exponents."""
    p = (alpha + 1.0) / 2.0                 # magnitude of the (negative) exponent
    if p == 1.0:                            # alpha == 1.0 (the module default)
        return 1.0 / t
    if float(p).is_integer():               # integer power: recip + multiplies
        inv = 1.0 / t
        out = inv
        for _ in range(int(p) - 1):
            out = out * inv
        return out
    if float(2.0 * p).is_integer():         # half-integer: rsqrt * recip^k
        out = jax.lax.rsqrt(t)
        inv = 1.0 / t
        for _ in range(int(p - 0.5)):
            out = out * inv
        return out
    return t ** (-p)                        # generic fallback


def _clustering_kernel(x_ref, ct_ref, csq_ref, q_ref, dis_ref, *, n_clusters, alpha):
    x = x_ref[...]                          # [bn, D]  (f32 in the default path)
    ct = ct_ref[...]                        # [D, Kp]  centers^T, pre-cast in wrapper

    xm = x if x.dtype == ct.dtype else x.astype(ct.dtype)
    xc = jnp.dot(xm, ct, preferred_element_type=jnp.float32)     # [bn, Kp]  MXU

    x_sq = jnp.sum(x * x, axis=-1, keepdims=True)                # [bn, 1]
    # Padded cluster lanes carry csq == +inf  ->  d2 == +inf  ->  dis == 0
    # exactly, so no iota/where mask is needed and the row sum is unaffected.
    d2 = jnp.maximum(x_sq + csq_ref[...] - 2.0 * xc, 0.0)        # [bn, Kp]

    t = d2 * (1.0 / alpha) + 1.0
    dis = _student_t_power(t, alpha)

    inv_row = 1.0 / jnp.sum(dis, axis=-1, keepdims=True)         # 1 divide per row
    q = dis * inv_row

    k = n_clusters                          # store only the real cluster lanes
    dis_ref[...] = dis[:, :k].astype(dis_ref.dtype)
    q_ref[...] = q[:, :k].astype(q_ref.dtype)


def _choose_block_n(N, D, K, Kp, in_itemsize, out_itemsize, ct_itemsize):
    """Row tile: multiple of 8, sized to a VMEM budget, balanced even tile count."""
    per_row = 2 * D * in_itemsize + 2 * 2 * K * out_itemsize     # double-buffered
    resident = 2 * D * Kp * ct_itemsize + 2 * Kp * 4             # centers^T + ||c||^2
    budget = 24 * 1024 * 1024                                    # safe for v7x 64MiB/TC
    cap = max(8, min(1024, ((budget - resident) // max(per_row, 1)) // 8 * 8))

    if N <= min(cap, 256):
        return N                            # single tile, no row padding at all
    n8 = _round_up(N, 8)
    n_tiles = max(2, -(-n8 // cap))
    if n_tiles % 2:
        n_tiles += 1                        # even tile count -> balanced dual-TC
    return max(8, min(cap, _round_up(-(-n8 // n_tiles), 8)))


def modeler_clustering_forward(H1, center, *, alpha=1.0, block_n=None,
                               matmul_dtype=None):
    """H1: [N, hidden]; center: [n_clusters, hidden] -> (Q [N, K], dis [N, K])."""
    N, D = H1.shape
    K, Dc = center.shape
    assert D == Dc
    out_dtype = H1.dtype
    out_isz = jnp.dtype(out_dtype).itemsize

    # Cluster axis padded to the 128-lane width only for the in-VMEM compute.
    Kp = _round_up(K, 128)

    ct = center.T
    if matmul_dtype is not None:
        ct = ct.astype(matmul_dtype)        # cast ONCE in the wrapper, never in-kernel
    csq = jnp.sum(jnp.square(center.astype(jnp.float32)), axis=-1)[None, :]  # [1, K]
    if Kp != K:
        ct = jnp.pad(ct, ((0, 0), (0, Kp - K)))
        csq = jnp.pad(csq, ((0, 0), (0, Kp - K)), constant_values=jnp.inf)

    if block_n is None:
        block_n = _choose_block_n(N, D, K, Kp, jnp.dtype(H1.dtype).itemsize,
                                  out_isz, jnp.dtype(ct.dtype).itemsize)
    else:
        block_n = min(block_n, N)
        if block_n < N:
            block_n = max(8, _round_up(block_n, 8))

    grid = (pl.cdiv(N, block_n),)           # tail tile is clipped: no jnp.pad of H1

    kernel = functools.partial(_clustering_kernel, n_clusters=K, alpha=float(alpha))

    vmem_bytes = (2 * block_n * D * jnp.dtype(H1.dtype).itemsize   # H1 (dbl-buffered)
                  + 2 * D * Kp * jnp.dtype(ct.dtype).itemsize      # centers^T
                  + 2 * Kp * 4                                     # ||c||^2
                  + 2 * 2 * block_n * K * out_isz                  # Q + dis
                  + 4 * block_n * Kp * 4)                          # f32 temporaries
    vmem_limit = int(min(64 * 1024 * 1024, max(vmem_bytes + (2 << 20), 8 << 20)))

    cost = pl.CostEstimate(
        flops=int(2 * N * D * Kp + 8 * N * Kp),
        transcendentals=int(2 * N * Kp),
        bytes_accessed=int(N * D * jnp.dtype(H1.dtype).itemsize
                           + D * Kp * jnp.dtype(ct.dtype).itemsize
                           + 2 * N * K * out_isz),
    )

    q, dis = pl.pallas_call(
        kernel,
        out_shape=(jax.ShapeDtypeStruct((N, K), out_dtype),
                   jax.ShapeDtypeStruct((N, K), out_dtype)),
        grid_spec=pltpu.PrefetchScalarGridSpec(
            num_scalar_prefetch=0,
            grid=grid,
            in_specs=[
                pl.BlockSpec((block_n, D), lambda i: (i, 0)),      # H1 row tile
                pl.BlockSpec((D, Kp), lambda i: (0, 0)),           # centers^T (resident)
                pl.BlockSpec((1, Kp), lambda i: (0, 0)),           # ||c||^2 (+inf padded)
            ],
            out_specs=[
                pl.BlockSpec((block_n, K), lambda i: (i, 0)),      # Q   (K lanes only)
                pl.BlockSpec((block_n, K), lambda i: (i, 0)),      # dis (K lanes only)
            ],
        ),
        compiler_params=pltpu.CompilerParams(
            dimension_semantics=("parallel",),
            vmem_limit_bytes=vmem_limit,
        ),
        cost_estimate=cost,
    )(H1, ct, csq)

    return q, dis


def modeler_clustering_reference(H1, center, alpha=1.0):
    diff = H1[:, None, :] - center[None, :, :]
    dis = (jnp.sum(diff * diff, axis=-1) / alpha + 1.0) ** (-(alpha + 1.0) / 2.0)
    Q = dis / jnp.sum(dis, axis=1, keepdims=True)
    return Q, dis


if __name__ == "__main__":
    key = jax.random.PRNGKey(0)
    k_h, k_c, k_h2 = jax.random.split(key, 3)

    # modeler_clustering(hidden=32, nb_classes=16), batch of 8 embeddings.
    N, hidden, nb_classes = 8, 32, 16

    H1 = jax.random.normal(k_h, (N, hidden), dtype=jnp.float32)
    # xavier_normal_-style init for the cluster centers (host-side, like
    # nn.init.xavier_normal_ in the PyTorch module).
    std = (2.0 / (nb_classes + hidden)) ** 0.5
    center = std * jax.random.normal(k_c, (nb_classes, hidden), dtype=jnp.float32)

    Q, dis = modeler_clustering_forward(H1, center)
    Q, dis = jax.block_until_ready((Q, dis))

    Q_ref, dis_ref = modeler_clustering_reference(H1, center)
    assert Q.shape == (N, nb_classes) and dis.shape == (N, nb_classes)
    assert jnp.allclose(dis, dis_ref, atol=1e-5, rtol=1e-5), "dis mismatch"
    assert jnp.allclose(Q, Q_ref, atol=1e-5, rtol=1e-5), "Q mismatch"
    assert jnp.allclose(jnp.sum(Q, axis=1), 1.0, atol=1e-5), "Q rows not normalized"

    # A non-multiple-of-8 batch exercises the full-dim (non-padded) row block.
    N2 = 20
    H2 = jax.random.normal(k_h2, (N2, hidden), dtype=jnp.float32)
    Q2, dis2 = jax.block_until_ready(modeler_clustering_forward(H2, center))
    Q2_ref, dis2_ref = modeler_clustering_reference(H2, center)
    assert jnp.allclose(dis2, dis2_ref, atol=1e-5, rtol=1e-5), "dis mismatch (N=20)"
    assert jnp.allclose(Q2, Q2_ref, atol=1e-5, rtol=1e-5), "Q mismatch (N=20)"

    print("KERNEL_OK")
</pallas_src>

<mosaic_0001>
module attributes {stable_mosaic.version = 11 : i64} {
  func.func @_clustering_kernel(%arg0: i32, %arg1: memref<8x32xf32, #tpu.memory_space<vmem>>, %arg2: memref<32x128xf32, #tpu.memory_space<vmem>>, %arg3: memref<1x128xf32, #tpu.memory_space<vmem>>, %arg4: memref<8x16xf32, #tpu.memory_space<vmem>>, %arg5: memref<8x16xf32, #tpu.memory_space<vmem>>) attributes {dimension_semantics = [#tpu.dimension_semantics<parallel>], iteration_bounds = array<i64: 1>, scalar_prefetch = 0 : i64, scratch_operands = 0 : i64, tpu.core_type = #tpu.core_type<tc>, window_params = [{transform_indices = @transform_0, window_bounds = array<i64: 8, 32>}, {pipeline_mode = #tpu.pipeline_mode<synchronous>, transform_indices = @transform_1, window_bounds = array<i64: 32, 128>}, {pipeline_mode = #tpu.pipeline_mode<synchronous>, transform_indices = @transform_2, window_bounds = array<i64: 1, 128>}, {transform_indices = @transform_3, window_bounds = array<i64: 8, 16>}, {transform_indices = @transform_4, window_bounds = array<i64: 8, 16>}]} {
    %c0 = arith.constant 0 : index
    %c0_0 = arith.constant 0 : index
    %0 = vector.load %arg1[%c0, %c0_0] : memref<8x32xf32, #tpu.memory_space<vmem>>, vector<8x32xf32>
    %c0_1 = arith.constant 0 : index
    %c0_2 = arith.constant 0 : index
    %1 = vector.load %arg2[%c0_1, %c0_2] : memref<32x128xf32, #tpu.memory_space<vmem>>, vector<32x128xf32>
    %cst = arith.constant dense<0.000000e+00> : vector<8x128xf32>
    %2 = tpu.matmul %0, %1, %cst {dimension_numbers = #tpu.dot_dimension_numbers<[1], [0], [0], [1], [0, 0, 1, 1], [], []>} : vector<8x32xf32>, vector<32x128xf32>, vector<8x128xf32> -> vector<8x128xf32>
    %3 = arith.mulf %0, %0 : vector<8x32xf32>
    %cst_3 = arith.constant dense<0.000000e+00> : vector<8xf32>
    %4 = vector.multi_reduction <add>, %3, %cst_3 [1] : vector<8x32xf32> to vector<8xf32>
    %5 = vector.shape_cast %4 : vector<8xf32> to vector<8x1xf32>
    %c0_4 = arith.constant 0 : index
    %c0_5 = arith.constant 0 : index
    %6 = vector.load %arg3[%c0_4, %c0_5] : memref<1x128xf32, #tpu.memory_space<vmem>>, vector<1x128xf32>
    %7 = vector.broadcast %5 : vector<8x1xf32> to vector<8x128xf32>
    %8 = vector.broadcast %6 : vector<1x128xf32> to vector<8x128xf32>
    %9 = arith.addf %7, %8 : vector<8x128xf32>
    %cst_6 = arith.constant 2.000000e+00 : f32
    %10 = vector.broadcast %cst_6 : f32 to vector<8x128xf32>
    %11 = arith.mulf %10, %2 : vector<8x128xf32>
    %12 = arith.subf %9, %11 : vector<8x128xf32>
    %cst_7 = arith.constant 0.000000e+00 : f32
    %13 = vector.broadcast %cst_7 : f32 to vector<8x128xf32>
    %14 = arith.maximumf %12, %13 : vector<8x128xf32>
    %cst_8 = arith.constant 1.000000e+00 : f32
    %15 = vector.broadcast %cst_8 : f32 to vector<8x128xf32>
    %16 = arith.mulf %14, %15 : vector<8x128xf32>
    %cst_9 = arith.constant 1.000000e+00 : f32
    %17 = vector.broadcast %cst_9 : f32 to vector<8x128xf32>
    %18 = arith.addf %16, %17 : vector<8x128xf32>
    %cst_10 = arith.constant 1.000000e+00 : f32
    %19 = vector.broadcast %cst_10 : f32 to vector<8x128xf32>
    %20 = arith.divf %19, %18 : vector<8x128xf32>
    %cst_11 = arith.constant dense<0.000000e+00> : vector<8xf32>
    %21 = vector.multi_reduction <add>, %20, %cst_11 [1] : vector<8x128xf32> to vector<8xf32>
    %22 = vector.shape_cast %21 : vector<8xf32> to vector<8x1xf32>
    %cst_12 = arith.constant 1.000000e+00 : f32
    %23 = vector.broadcast %cst_12 : f32 to vector<8x1xf32>
    %24 = arith.divf %23, %22 : vector<8x1xf32>
    %25 = vector.broadcast %24 : vector<8x1xf32> to vector<8x128xf32>
    %26 = arith.mulf %20, %25 : vector<8x128xf32>
    %27 = vector.extract_strided_slice %20 {offsets = [0, 0], sizes = [8, 16], strides = [1, 1]} : vector<8x128xf32> to vector<8x16xf32>
    %c0_13 = arith.constant 0 : index
    %c0_14 = arith.constant 0 : index
    %28 = vector.load %arg5[%c0_13, %c0_14] : memref<8x16xf32, #tpu.memory_space<vmem>>, vector<8x16xf32>
    tpu.vector_store %arg5[%c0_13, %c0_14], %27 {strides = array<i32>} : memref<8x16xf32, #tpu.memory_space<vmem>>, vector<8x16xf32>,
    %29 = vector.extract_strided_slice %26 {offsets = [0, 0], sizes = [8, 16], strides = [1, 1]} : vector<8x128xf32> to vector<8x16xf32>
    %c0_15 = arith.constant 0 : index
    %c0_16 = arith.constant 0 : index
    %30 = vector.load %arg4[%c0_15, %c0_16] : memref<8x16xf32, #tpu.memory_space<vmem>>, vector<8x16xf32>
    tpu.vector_store %arg4[%c0_15, %c0_16], %29 {strides = array<i32>} : memref<8x16xf32, #tpu.memory_space<vmem>>, vector<8x16xf32>,
    return
  }
  func.func @transform_0(%arg0: i32) -> (i32, i32) {
    %c0_i32 = arith.constant 0 : i32
    %c0_i32_0 = arith.constant 0 : i32
    return %arg0, %c0_i32 : i32, i32
  }
  func.func @transform_1(%arg0: i32) -> (i32, i32) {
    %c0_i32 = arith.constant 0 : i32
    %c0_i32_0 = arith.constant 0 : i32
    %c0_i32_1 = arith.constant 0 : i32
    return %c0_i32, %c0_i32_0 : i32, i32
  }
  func.func @transform_2(%arg0: i32) -> (i32, i32) {
    %c0_i32 = arith.constant 0 : i32
    %c0_i32_0 = arith.constant 0 : i32
    %c0_i32_1 = arith.constant 0 : i32
    return %c0_i32, %c0_i32_0 : i32, i32
  }
  func.func @transform_3(%arg0: i32) -> (i32, i32) {
    %c0_i32 = arith.constant 0 : i32
    %c0_i32_0 = arith.constant 0 : i32
    return %arg0, %c0_i32 : i32, i32
  }
  func.func @transform_4(%arg0: i32) -> (i32, i32) {
    %c0_i32 = arith.constant 0 : i32
    %c0_i32_0 = arith.constant 0 : i32
    return %arg0, %c0_i32 : i32, i32
  }
}

</mosaic_0001>

<bundles_post_ra>
// kernel: tpu_custom_call.1
= control target key start
LH: loop header
LB: loop body
LE: loop exit
PB: predicated region body
PF: predicated region fallthrough
CT: control target
= control target key end

     0   :  { %10 = vsyncpa [#allocation3], 0  ;;  %s324_s0 = inlined_call_operand.hbm [shape: f32[8,32], index: 0, kind: input, shape index: {}]   ;;  %s325_s1 = inlined_call_operand.hbm [shape: f32[32,128], index: 1, kind: input, shape index: {}]   ;;  %s326_s2 = inlined_call_operand.vmem [shape: f32[1,128], index: 2, kind: input, shape index: {}]   ;;  %s327_s3 = inlined_call_operand.hbm [shape: f32[8,16], index: 3, kind: output, shape index: {0}]   ;;  %s328_s4 = inlined_call_operand.hbm [shape: f32[8,16], index: 4, kind: output, shape index: {1}]  }
   0x1   :  { %11 = vsyncpa [#allocation6], 0 }
   0x2   :  { %12 = vsyncpa [#allocation4], 0 }
   0x3   :  { %13 = vsyncpa [#allocation9], 0  ;;  %s19_s17 = sshll.u32 %s324_s0, 4  ;;  %s276_s18 = smov [#allocation2]   ;;  %s20_s17 = int_to_ptr.hbm [resolvable:$true] %s19_s17 }
   0x4   :  { %s21_s19 = sshll.u32 %s276_s18, 4  ;;  %s29_s22 = sshll.u32 %s325_s1, 4  ;;  %s22_s19 = int_to_ptr.vmem [resolvable:$true] %s21_s19  ;;  %s30_s22 = int_to_ptr.hbm [resolvable:$true] %s29_s22 }
   0x5   :  { %24 = dma.hbm_to_vmem [thread:$0]  %s20_s17, 128, %s22_s19, [#allocation3]  }
   0x6   :  { %s277_s23 = smov [#allocation5]   ;;  %s278_s25 = smov 128  }
   0x7   :  { %s31_s24 = sshll.u32 %s277_s23, 4  ;;  %s279_s26 = smov 8   ;;  %s32_s24 = int_to_ptr.vmem [resolvable:$true] %s31_s24 }
   0x8   :  { %37 = dma.hbm_to_vmem [thread:$0]  %s30_s22, 512, %s32_s24, [#allocation6], %s278_s25, %s278_s25, %s279_s26  }
   0x9   :  { %268 = dma.done.wait [#allocation3], 128  }
   0xa   :  { %269 = vsyncadd [#allocation3], 4294967168 }
   0xb   :  { %270 = dma.done.wait [#allocation6], 512  }
   0xc   :  { %271 = vsyncadd [#allocation6], 4294966784  ;;  %v52_v0 = vld [vmem:[#allocation5 + $0x18] sm:$0xff]  ;;  %v51_v1 = vld [vmem:[#allocation5 + $0x10] sm:$0xff]  ;;  %vm53_vm0 = vcmask 261120   ;;  %vm123_vm4 = vcmask 130048  }
   0xd   :  { %69 = vmatpush.msra.mxu0 %v52_v0  ;;  %v48_v2 = vld [vmem:[#allocation2] sm:$0xff]  ;;  %v50_v3 = vld [vmem:[#allocation5 + $0x8] sm:$0xff]  ;;  %v49_v5 = vld [vmem:[#allocation5] sm:$0xff]  ;;  %s144_s30 = sshll.u32 %s328_s4, 4  ;;  %s281_s5 = smov [#allocation7]   ;;  %s145_s30 = int_to_ptr.hbm [resolvable:$true] %s144_s30 }
   0xe   :  { %v77_v4 = vmul.f32 %v48_v2, %v48_v2  ;;  %v167_v7 = vld [vmem:[%s326_s2] ss:$0 sm:$0xff]  ;;  %s280_s2 = smov [#allocation8]   ;;  %s131_s6 = sshll.u32 %s281_s5, 4  ;;  %s132_s6 = int_to_ptr.vmem [resolvable:$true] %s131_s6 }
   0xf   :  { %70 = vmatpush.msra.mxu0 %v51_v1  ;;  %s142_s27 = sshll.u32 %s280_s2, 4  ;;  %s133_s8 = sshll.u32 %s327_s3, 4  ;;  %s143_s27 = int_to_ptr.vmem [resolvable:$true] %s142_s27  ;;  %s134_s8 = int_to_ptr.hbm [resolvable:$true] %s133_s8 }
  0x10   :  { %v78_v6 = vsel %vm53_vm0, %v77_v4, 0.0 }
  0x11   :  { %71 = vmatpush.msra.mxu0 %v50_v3  ;;  %79 = vadd.xlane.f32.xlu0 %v78_v6 }
  0x13   :  { %72 = vmatpush.msra.mxu0 %v49_v5 }
  0x14   :  { %160 = vmatmul.msk.f32.vlgmr.msra.gmra.mxu0 %vm53_vm0, %v48_v2 }
  0x84   :  { %v80_v8 = vpop.xlane.xlu0 %79 }
  0x85   :  { %v85_v9 = vadd.f32 %v167_v7, %v80_v8 }
  0x91   :  { %v74_v10 = vpop.f32.mrf.mxu0 }
  0x92   :  { %v86_v11 = vmul.f32 2.0, %v74_v10 }
  0x94   :  { %v87_v12 = vsub.f32 %v85_v9, %v86_v11 }
  0x96   :  { %v88_v13 = vmax.f32 %v87_v12, 0.0 }
  0x98   :  { %v89_v14 = vadd.f32 1.0, %v88_v13 }
  0x9a   :  { %168 = vrcp.f32 %v89_v14  ;;  %v101_v18 = vand.u32 2147483648, %v89_v14  ;;  %v99_v20 = vand.u32 2147483647, %v89_v14  ;;  %vm95_vm2 = vweird.f32 %v89_v14 }
  0x9c   :  { %v102_v22 = vor.u32 1.1754944e-38, %v101_v18  ;;  %vm100_vm5 = vcmp.eq.f32.partialorder %v99_v20, 8.507059e+37 }
  0xa0   :  { %v169_v15 = vpop.eup %168 }
  0xa1   :  { %v91_v16 = vmul.f32 %v169_v15, %v89_v14  ;;  %vm96_vm1 = vweird.f32 %v169_v15 }
  0xa2   :  { %vm97_vm3 = vmor %vm95_vm2, %vm96_vm1 }
  0xa3   :  { %v92_v17 = vsub.f32 1.0, %v91_v16 }
  0xa5   :  { %v93_v19 = vmul.f32 %v169_v15, %v92_v17 }
  0xa7   :  { %v94_v21 = vadd.f32 %v169_v15, %v93_v19 }
  0xa9   :  { %v98_v23 = vsel %vm97_vm3, %v169_v15, %v94_v21 }
  0xaa   :  { %v103_v24 = vsel %vm100_vm5, %v102_v22, %v98_v23 }
  0xab   :  { %105 = vadd.xlane.f32.xlu0 %v103_v24  ;;  %124 = vst.msk [vmem:[#allocation8] sm:$0xff] %vm123_vm4, %v103_v24 }
  0xac   :  { %147 = dma.vmem_to_hbm [thread:$0]  %s143_s27, 128, %s145_s30, [#allocation9]  }
 0x11e   :  { %v106_v25 = vpop.xlane.xlu0 %105 }
 0x11f   :  { %170 = vrcp.f32 %v106_v25  ;;  %v118_v29 = vand.u32 2147483648, %v106_v25  ;;  %v116_v31 = vand.u32 2147483647, %v106_v25  ;;  %vm112_vm7 = vweird.f32 %v106_v25 }
 0x121   :  { %v119_v33 = vor.u32 1.1754944e-38, %v118_v29  ;;  %vm117_vm9 = vcmp.eq.f32.partialorder %v116_v31, 8.507059e+37 }
 0x125   :  { %v171_v26 = vpop.eup %170 }
 0x126   :  { %v108_v27 = vmul.f32 %v171_v26, %v106_v25  ;;  %vm113_vm6 = vweird.f32 %v171_v26 }
 0x127   :  { %vm114_vm8 = vmor %vm112_vm7, %vm113_vm6 }
 0x128   :  { %v109_v28 = vsub.f32 1.0, %v108_v27 }
 0x12a   :  { %v110_v30 = vmul.f32 %v171_v26, %v109_v28 }
 0x12c   :  { %v111_v32 = vadd.f32 %v171_v26, %v110_v30 }
 0x12e   :  { %v115_v34 = vsel %vm114_vm8, %v171_v26, %v111_v32 }
 0x12f   :  { %v120_v35 = vsel %vm117_vm9, %v119_v33, %v115_v34 }
 0x130   :  { %v122_v36 = vmul.f32 %v120_v35, %v103_v24 }
 0x132   :  { %125 = vst.msk [vmem:[#allocation7] sm:$0xff] %vm123_vm4, %v122_v36 }
 0x133   :  { %136 = dma.vmem_to_hbm [thread:$0]  %s132_s6, 128, %s134_s8, [#allocation4]  }
 0x134   :  { %272 = dma.done.wait [#allocation4], 128  }
 0x135   :  { %273 = vsyncadd [#allocation4], 4294967168 }
 0x136   :  { %274 = dma.done.wait [#allocation9], 128  }
 0x137   :  { %275 = vsyncadd [#allocation9], 4294967168 }
 0x138   :  { %156 = vsyncpa [#allocation3], 1 }
 0x139   :  { %157 = vsyncpa [#allocation6], 1 }
 0x13a   :  { %158 = vsyncpa [#allocation4], 1 }
 0x13b   :  { %159 = vsyncpa [#allocation9], 1 }

</bundles_post_ra>
